<compile_context>
chip_gen: v5e
topology: v5e:2x2
jax: 0.10.0
libtpu: 0.0.40
codegen_flags: <defaults>
</compile_context>

<pallas_src>
import functools

import jax
import jax.numpy as jnp
from jax.experimental import pallas as pl
from jax.experimental.pallas import tpu as pltpu


_EPS = 1e-12  # matches torch.nn.functional.normalize default


def _rmsnorm_kernel(x_ref, gamma_ref, o_ref, *, scale):
    # x_ref: (block_rows, dim)   gamma_ref: (1, dim) f32   o_ref: (block_rows, dim)
    x = x_ref[...].astype(jnp.float32)

    # Sum of squares along the lane (last) axis, accumulated in f32.
    sumsq = jnp.sum(x * x, axis=-1, keepdims=True)                # (block_rows, 1)

    # 1 / max(||x||, eps) == rsqrt(max(sumsq, eps^2)); fold sqrt(dim) in.
    inv = jax.lax.rsqrt(jnp.maximum(sumsq, _EPS * _EPS)) * scale  # (block_rows, 1)

    o_ref[...] = (x * inv * gamma_ref[...]).astype(o_ref.dtype)


def _pick_block_rows(rows, dim, itemsize, block_rows):
    if block_rows is None:
        # Budget ~16 MiB for the 4 pipelined tiles (2 input + 2 output
        # double-buffers); conservative enough for v7x's 64 MiB per-TC VMEM.
        budget = 16 * 1024 * 1024
        per_buffer = budget // 4
        block_rows = per_buffer // max(1, dim * itemsize)
        block_rows = min(block_rows, 1024)
    # Never larger than the (8-aligned) row count; always a multiple of 8, >= 8.
    rows_to_8 = ((rows + 7) // 8) * 8
    block_rows = min(block_rows, rows_to_8)
    block_rows = max(8, (block_rows // 8) * 8)
    return block_rows


def rmsnorm(x, gamma, *, block_rows=None):
    """Pallas RMSNorm.  x: (..., dim), gamma: (dim,)."""
    dim = x.shape[-1]
    scale = float(dim) ** 0.5

    orig_shape = x.shape
    x2 = x.reshape(-1, dim)                          # (rows, dim), dim on lanes
    rows = x2.shape[0]

    itemsize = jnp.dtype(x.dtype).itemsize
    block_rows = _pick_block_rows(rows, dim, itemsize, block_rows)

    # No padding copy: cdiv grid, Pallas masks the partial last block.
    grid = (pl.cdiv(rows, block_rows),)

    gamma2 = gamma.reshape(1, dim).astype(jnp.float32)

    # Explicit VMEM limit: 2x input tile + 2x output tile + gamma + headroom.
    tile_bytes = block_rows * dim * itemsize
    vmem_limit = int(4 * tile_bytes + dim * 4 + (8 << 20))
    vmem_limit = max(vmem_limit, 16 << 20)
    vmem_limit = min(vmem_limit, 48 << 20)           # stay under v7x physical VMEM

    out = pl.pallas_call(
        functools.partial(_rmsnorm_kernel, scale=scale),
        out_shape=jax.ShapeDtypeStruct((rows, dim), x.dtype),
        grid_spec=pltpu.PrefetchScalarGridSpec(
            num_scalar_prefetch=0,
            grid=grid,
            in_specs=[
                pl.BlockSpec((block_rows, dim), lambda i: (i, 0)),
                pl.BlockSpec((1, dim), lambda i: (0, 0)),
            ],
            out_specs=pl.BlockSpec((block_rows, dim), lambda i: (i, 0)),
        ),
        compiler_params=pltpu.CompilerParams(
            dimension_semantics=("parallel",),
            vmem_limit_bytes=vmem_limit,
        ),
    )(x2, gamma2)

    return out.reshape(orig_shape)


def rmsnorm_ref(x, gamma):
    dim = x.shape[-1]
    scale = dim ** 0.5
    norm = jnp.sqrt(jnp.sum(x.astype(jnp.float32) ** 2, axis=-1, keepdims=True))
    normalized = x.astype(jnp.float32) / jnp.maximum(norm, _EPS)
    return (normalized * scale * gamma).astype(x.dtype)


if __name__ == "__main__":
    key = jax.random.PRNGKey(0)
    batch, seq, hidden = 2, 8, 32

    kx, kg = jax.random.split(key)
    x = jax.random.normal(kx, (batch, seq, hidden), dtype=jnp.float32)
    # Module initializes gamma = ones(dim); perturb deterministically so the
    # gamma multiply is actually exercised.
    gamma = jnp.ones((hidden,), dtype=jnp.float32) + 0.01 * jax.random.normal(
        kg, (hidden,), dtype=jnp.float32)

    out = rmsnorm(x, gamma)
    jax.block_until_ready(out)

    ref = rmsnorm_ref(x, gamma)
    assert out.shape == x.shape
    assert jnp.allclose(out, ref, atol=1e-5, rtol=1e-5), "mismatch vs reference"

    # Also exercise a non-divisible row count (partial last block, no padding copy).
    x_odd = jax.random.normal(kx, (3, 7, hidden), dtype=jnp.float32)
    out_odd = rmsnorm(x_odd, gamma, block_rows=8)
    jax.block_until_ready(out_odd)
    assert jnp.allclose(out_odd, rmsnorm_ref(x_odd, gamma), atol=1e-5, rtol=1e-5)

    print("KERNEL_OK")
</pallas_src>

<mosaic_0001>
module attributes {stable_mosaic.version = 11 : i64} {
  func.func @_rmsnorm_kernel(%arg0: i32, %arg1: memref<16x32xf32, #tpu.memory_space<vmem>>, %arg2: memref<1x32xf32, #tpu.memory_space<vmem>>, %arg3: memref<16x32xf32, #tpu.memory_space<vmem>>) attributes {dimension_semantics = [#tpu.dimension_semantics<parallel>], iteration_bounds = array<i64: 1>, scalar_prefetch = 0 : i64, scratch_operands = 0 : i64, tpu.core_type = #tpu.core_type<tc>, window_params = [{transform_indices = @transform_0, window_bounds = array<i64: 16, 32>}, {pipeline_mode = #tpu.pipeline_mode<synchronous>, transform_indices = @transform_1, window_bounds = array<i64: 1, 32>}, {transform_indices = @transform_2, window_bounds = array<i64: 16, 32>}]} {
    %c0 = arith.constant 0 : index
    %c0_0 = arith.constant 0 : index
    %0 = vector.load %arg1[%c0, %c0_0] : memref<16x32xf32, #tpu.memory_space<vmem>>, vector<16x32xf32>
    %1 = arith.mulf %0, %0 : vector<16x32xf32>
    %cst = arith.constant dense<0.000000e+00> : vector<16xf32>
    %2 = vector.multi_reduction <add>, %1, %cst [1] : vector<16x32xf32> to vector<16xf32>
    %3 = vector.shape_cast %2 : vector<16xf32> to vector<16x1xf32>
    %cst_1 = arith.constant 1.000000e-24 : f32
    %4 = vector.broadcast %cst_1 : f32 to vector<16x1xf32>
    %5 = arith.maximumf %3, %4 : vector<16x1xf32>
    %6 = math.rsqrt %5 : vector<16x1xf32>
    %cst_2 = arith.constant 5.65685415 : f32
    %7 = vector.broadcast %cst_2 : f32 to vector<16x1xf32>
    %8 = arith.mulf %6, %7 : vector<16x1xf32>
    %9 = vector.broadcast %8 : vector<16x1xf32> to vector<16x32xf32>
    %10 = arith.mulf %0, %9 : vector<16x32xf32>
    %c0_3 = arith.constant 0 : index
    %c0_4 = arith.constant 0 : index
    %11 = vector.load %arg2[%c0_3, %c0_4] : memref<1x32xf32, #tpu.memory_space<vmem>>, vector<1x32xf32>
    %12 = vector.broadcast %11 : vector<1x32xf32> to vector<16x32xf32>
    %13 = arith.mulf %10, %12 : vector<16x32xf32>
    %c0_5 = arith.constant 0 : index
    %c0_6 = arith.constant 0 : index
    %14 = vector.load %arg3[%c0_5, %c0_6] : memref<16x32xf32, #tpu.memory_space<vmem>>, vector<16x32xf32>
    tpu.vector_store %arg3[%c0_5, %c0_6], %13 {strides = array<i32>} : memref<16x32xf32, #tpu.memory_space<vmem>>, vector<16x32xf32>,
    return
  }
  func.func @transform_0(%arg0: i32) -> (i32, i32) {
    %c0_i32 = arith.constant 0 : i32
    %c0_i32_0 = arith.constant 0 : i32
    return %arg0, %c0_i32 : i32, i32
  }
  func.func @transform_1(%arg0: i32) -> (i32, i32) {
    %c0_i32 = arith.constant 0 : i32
    %c0_i32_0 = arith.constant 0 : i32
    %c0_i32_1 = arith.constant 0 : i32
    return %c0_i32, %c0_i32_0 : i32, i32
  }
  func.func @transform_2(%arg0: i32) -> (i32, i32) {
    %c0_i32 = arith.constant 0 : i32
    %c0_i32_0 = arith.constant 0 : i32
    return %arg0, %c0_i32 : i32, i32
  }
}

</mosaic_0001>

<bundles_post_ra>
// kernel: tpu_custom_call.1
= control target key start
LH: loop header
LB: loop body
LE: loop exit
PB: predicated region body
PF: predicated region fallthrough
CT: control target
= control target key end

     0   :  { %7 = vsyncpa [#allocation3], 0  ;;  %s234_s0 = inlined_call_operand.hbm [shape: f32[16,32], index: 0, kind: input, shape index: {}]   ;;  %s235_s1 = inlined_call_operand.hbm [shape: f32[1,32], index: 1, kind: input, shape index: {}]   ;;  %s236_s2 = inlined_call_operand.hbm [shape: f32[16,32], index: 2, kind: output, shape index: {}]  }
   0x1   :  { %8 = vsyncpa [#allocation6], 0 }
   0x2   :  { %9 = vsyncpa [#allocation4], 0  ;;  %s14_s11 = sshll.u32 %s234_s0, 4  ;;  %s195_s12 = smov [#allocation2]   ;;  %s15_s11 = int_to_ptr.hbm [resolvable:$true] %s14_s11 }
   0x3   :  { %s16_s13 = sshll.u32 %s195_s12, 4  ;;  %s28_s16 = sshll.u32 %s235_s1, 4  ;;  %s17_s13 = int_to_ptr.vmem [resolvable:$true] %s16_s13  ;;  %s29_s16 = int_to_ptr.hbm [resolvable:$true] %s28_s16 }
   0x4   :  { %s196_s17 = smov 128   ;;  %s197_s18 = smov 8  }
   0x5   :  { %22 = dma.hbm_to_vmem [thread:$0]  %s15_s11, 256, %s17_s13, [#allocation3], %s196_s17, %s196_s17, %s197_s18  }
   0x6   :  { %s198_s19 = smov [#allocation5]  }
   0x7   :  { %s30_s20 = sshll.u32 %s198_s19, 4  ;;  %s31_s20 = int_to_ptr.vmem [resolvable:$true] %s30_s20 }
   0x8   :  { %33 = dma.hbm_to_vmem [thread:$0]  %s29_s16, 16, %s31_s20, [#allocation6]  }
   0x9   :  { %189 = dma.done.wait [#allocation3], 256  }
   0xa   :  { %190 = vsyncadd [#allocation3], 4294967040 }
   0xb   :  { %191 = dma.done.wait [#allocation6], 16  }
   0xc   :  { %192 = vsyncadd [#allocation6], 4294967280  ;;  %v42_v0 = vld [vmem:[#allocation2] sm:$0xff]  ;;  %vm46_vm0 = vcmask 261120   ;;  %v43_v2 = vld [vmem:[#allocation2 + $0x8] sm:$0xff]  ;;  %s199_s0 = smov [#allocation7]  }
   0xd   :  { %v44_v1 = vmul.f32 %v42_v0, %v42_v0  ;;  %v45_v4 = vmul.f32 %v43_v2, %v43_v2  ;;  %v112_v21 = vld [vmem:[#allocation5] ss:$0 sm:$0xff]  ;;  %s91_s1 = sshll.u32 %s199_s0, 4  ;;  %s93_s23 = sshll.u32 %s236_s2, 4  ;;  %s92_s1 = int_to_ptr.vmem [resolvable:$true] %s91_s1  ;;  %s94_s23 = int_to_ptr.hbm [resolvable:$true] %s93_s23 }
   0xf   :  { %v47_v3 = vsel %vm46_vm0, %v44_v1, 0.0  ;;  %v50_v5 = vsel %vm46_vm0, %v45_v4, 0.0 }
  0x10   :  { %48 = vadd.xlane.f32.xlu0 %v47_v3 }
  0x18   :  { %51 = vadd.xlane.f32.xlu0 %v50_v5 }
  0x83   :  { %v49_v6 = vpop.xlane.xlu0 %48 }
  0x84   :  { %v53_v7 = vmax.f32 %v49_v6, 1e-24 }
  0x86   :  { %113 = vrsqrt.f32 %v53_v7  ;;  %vm61_vm2 = vweird.f32 %v53_v7 }
  0x8b   :  { %v52_v8 = vpop.xlane.xlu0 %51 }
  0x8c   :  { %v114_v9 = vpop.eup %113  ;;  %v54_v10 = vmax.f32 %v52_v8, 1e-24 }
  0x8d   :  { %v56_v11 = vmul.f32 %v114_v9, %v53_v7  ;;  %vm62_vm1 = vweird.f32 %v114_v9 }
  0x8e   :  { %115 = vrsqrt.f32 %v54_v10  ;;  %vm63_vm3 = vmor %vm61_vm2, %vm62_vm1  ;;  %vm71_vm5 = vweird.f32 %v54_v10 }
  0x8f   :  { %v57_v12 = vmul.f32 %v114_v9, %v56_v11 }
  0x91   :  { %v58_v13 = vmul.f32 0.5, %v57_v12 }
  0x93   :  { %v59_v14 = vsub.f32 1.5, %v58_v13 }
  0x94   :  { %v116_v15 = vpop.eup %115 }
  0x95   :  { %v60_v16 = vmul.f32 %v114_v9, %v59_v14  ;;  %v66_v17 = vmul.f32 %v116_v15, %v54_v10  ;;  %vm72_vm4 = vweird.f32 %v116_v15 }
  0x96   :  { %vm73_vm6 = vmor %vm71_vm5, %vm72_vm4 }
  0x97   :  { %v64_v18 = vsel %vm63_vm3, %v114_v9, %v60_v16  ;;  %v67_v19 = vmul.f32 %v116_v15, %v66_v17 }
  0x98   :  { %v75_v20 = vmul.f32 5.656854, %v64_v18 }
  0x99   :  { %v68_v22 = vmul.f32 0.5, %v67_v19 }
  0x9a   :  { %v77_v23 = vmul.f32 %v75_v20, %v42_v0 }
  0x9b   :  { %v69_v24 = vsub.f32 1.5, %v68_v22 }
  0x9c   :  { %v83_v25 = vmul.f32 %v112_v21, %v77_v23 }
  0x9d   :  { %v70_v26 = vmul.f32 %v116_v15, %v69_v24 }
  0x9e   :  { %85 = vst.msk [vmem:[#allocation7] sm:$0xff] %vm46_vm0, %v83_v25 }
  0x9f   :  { %v74_v27 = vsel %vm73_vm6, %v116_v15, %v70_v26 }
  0xa0   :  { %v76_v28 = vmul.f32 5.656854, %v74_v27 }
  0xa2   :  { %v78_v29 = vmul.f32 %v76_v28, %v43_v2 }
  0xa4   :  { %v84_v30 = vmul.f32 %v112_v21, %v78_v29 }
  0xa6   :  { %86 = vst.msk [vmem:[#allocation7 + $0x8] sm:$0xff] %vm46_vm0, %v84_v30 }
  0xa7   :  { %99 = dma.vmem_to_hbm [thread:$0]  %s92_s1, 256, %s94_s23, [#allocation4], %s196_s17, %s196_s17, %s197_s18  }
  0xa8   :  { %193 = dma.done.wait [#allocation4], 256  }
  0xa9   :  { %194 = vsyncadd [#allocation4], 4294967040 }
  0xaa   :  { %104 = vsyncpa [#allocation3], 1 }
  0xab   :  { %105 = vsyncpa [#allocation6], 1 }
  0xac   :  { %106 = vsyncpa [#allocation4], 1 }

</bundles_post_ra>
